<compile_context>
chip_gen: v7x
topology: tpu7x:2x2x1
jax: 0.10.0
libtpu: 0.0.40
codegen_flags: <defaults>
</compile_context>

<pallas_src>
import functools

import jax
import jax.numpy as jnp
from jax.experimental import pallas as pl
from jax.experimental.pallas import tpu as pltpu

IN_FEATURES = 17 * 17   # 289
K_PAD = 384             # 289 padded up to 3*128 lanes
H1 = 512
H2 = 128
OUT = 2
OUT_PAD = 128           # lane-dense output slab; real logits are [:, :2]
NEG_SLOPE = 0.01
BN_EPS = 1e-5


def _round_up(x, m):
    return ((x + m - 1) // m) * m


def _leaky_relu(x):
    return jnp.where(x > 0, x, NEG_SLOPE * x)


def mlp3_kernel(x_ref,
                w1_ref, b1_ref,
                w2_ref, b2_ref,
                w3_ref, b3_ref,
                o_ref):
    # Layer 1: Linear (BN already folded into w1/b1) + LeakyReLU.
    # bf16 operands feed the MXU; accumulation and epilogue in f32.
    h = jnp.dot(x_ref[...], w1_ref[...],
                preferred_element_type=jnp.float32) + b1_ref[...]
    h = _leaky_relu(h)

    # Layer 2: Linear (folded BN) + LeakyReLU.
    h = jnp.dot(h.astype(jnp.bfloat16), w2_ref[...],
                preferred_element_type=jnp.float32) + b2_ref[...]
    h = _leaky_relu(h)

    # Layer 3: Linear -> lane-padded logits (columns >= 2 are zero weights).
    o_ref[...] = (jnp.dot(h.astype(jnp.bfloat16), w3_ref[...],
                          preferred_element_type=jnp.float32)
                  + b3_ref[...]).astype(o_ref.dtype)


@functools.partial(jax.jit, static_argnames=("tile_b",))
def mlp3_forward(x, params, *, tile_b=1024):
    """x: (B, 17, 17) float32 -> logits (B, 2) float32."""
    B = x.shape[0]
    x_flat = x.reshape(B, IN_FEATURES)

    (w1, b1, g1, beta1, rm1, rv1,
     w2, b2, g2, beta2, rm2, rv2,
     w3, b3) = params

    # ---- Fold BatchNorm (eval mode) into the linear weights/biases (glue) ----
    s1 = g1 / jnp.sqrt(rv1 + BN_EPS)
    t1 = beta1 - rm1 * s1
    s2 = g2 / jnp.sqrt(rv2 + BN_EPS)
    t2 = beta2 - rm2 * s2

    w1f = w1 * s1[None, :]               # (289, 512)
    b1f = (b1 * s1 + t1).reshape(1, H1)  # (1, 512)
    w2f = w2 * s2[None, :]               # (512, 128)
    b2f = (b2 * s2 + t2).reshape(1, H2)  # (1, 128)

    # ---- Pad shapes to TPU-friendly tiles (glue) ----
    # Contraction dim 289 -> 384 (zeros), output dim 2 -> 128 (zero columns).
    w1p = jnp.pad(w1f, ((0, K_PAD - IN_FEATURES), (0, 0))).astype(jnp.bfloat16)
    w2p = w2f.astype(jnp.bfloat16)
    w3p = jnp.pad(w3, ((0, 0), (0, OUT_PAD - OUT))).astype(jnp.bfloat16)
    b3p = jnp.pad(b3, (0, OUT_PAD - OUT)).reshape(1, OUT_PAD)

    # Batch tiling: pad B up so every grid step is a full tile.
    TILE_B = min(tile_b, _round_up(B, 8))
    B_pad = _round_up(B, TILE_B)
    x_pad = jnp.pad(
        x_flat, ((0, B_pad - B), (0, K_PAD - IN_FEATURES))
    ).astype(jnp.bfloat16)

    grid = (B_pad // TILE_B,)

    # Activation tiles stream over the batch grid; weights/biases are resident
    # (constant block index) on every grid step.
    x_spec = pl.BlockSpec((TILE_B, K_PAD), lambda i: (i, 0))
    o_spec = pl.BlockSpec((TILE_B, OUT_PAD), lambda i: (i, 0))
    w1_spec = pl.BlockSpec((K_PAD, H1), lambda i: (0, 0))
    b1_spec = pl.BlockSpec((1, H1), lambda i: (0, 0))
    w2_spec = pl.BlockSpec((H1, H2), lambda i: (0, 0))
    b2_spec = pl.BlockSpec((1, H2), lambda i: (0, 0))
    w3_spec = pl.BlockSpec((H2, OUT_PAD), lambda i: (0, 0))
    b3_spec = pl.BlockSpec((1, OUT_PAD), lambda i: (0, 0))

    flops = 2 * B_pad * (K_PAD * H1 + H1 * H2 + H2 * OUT_PAD)
    bytes_accessed = (x_pad.size * 2 + B_pad * OUT_PAD * 4
                      + (w1p.size + w2p.size + w3p.size) * 2
                      + (b1f.size + b2f.size + b3p.size) * 4)

    out_padded = pl.pallas_call(
        mlp3_kernel,
        out_shape=jax.ShapeDtypeStruct((B_pad, OUT_PAD), jnp.float32),
        grid=grid,
        in_specs=[x_spec,
                  w1_spec, b1_spec,
                  w2_spec, b2_spec,
                  w3_spec, b3_spec],
        out_specs=o_spec,
        compiler_params=pltpu.CompilerParams(
            dimension_semantics=("parallel",)),
        cost_estimate=pl.CostEstimate(
            flops=flops, transcendentals=0, bytes_accessed=bytes_accessed),
    )(x_pad, w1p, b1f, w2p, b2f, w3p, b3p)

    return out_padded[:B, :OUT]


def init_params(key):
    """Deterministic parameter init (PyTorch-like uniform(-1/sqrt(fan_in), ...))."""
    keys = jax.random.split(key, 6)

    def lin(kw, kb, fan_in, fan_out):
        bound = 1.0 / jnp.sqrt(fan_in)
        # stored as (fan_in, fan_out) so the kernel computes x @ W
        w = jax.random.uniform(kw, (fan_in, fan_out), jnp.float32, -bound, bound)
        b = jax.random.uniform(kb, (fan_out,), jnp.float32, -bound, bound)
        return w, b

    w1, b1 = lin(keys[0], keys[1], IN_FEATURES, H1)
    w2, b2 = lin(keys[2], keys[3], H1, H2)
    w3, b3 = lin(keys[4], keys[5], H2, OUT)

    # BatchNorm1d default init: weight=1, bias=0, running_mean=0, running_var=1
    g1 = jnp.ones((H1,), jnp.float32); beta1 = jnp.zeros((H1,), jnp.float32)
    rm1 = jnp.zeros((H1,), jnp.float32); rv1 = jnp.ones((H1,), jnp.float32)
    g2 = jnp.ones((H2,), jnp.float32); beta2 = jnp.zeros((H2,), jnp.float32)
    rm2 = jnp.zeros((H2,), jnp.float32); rv2 = jnp.ones((H2,), jnp.float32)

    return (w1, b1, g1, beta1, rm1, rv1,
            w2, b2, g2, beta2, rm2, rv2,
            w3, b3)


def reference_forward(x, params):
    """Pure-JAX f32 reference (eval-mode BN) for correctness check."""
    (w1, b1, g1, beta1, rm1, rv1,
     w2, b2, g2, beta2, rm2, rv2,
     w3, b3) = params
    B = x.shape[0]
    h = x.reshape(B, IN_FEATURES)
    h = h @ w1 + b1
    h = (h - rm1) / jnp.sqrt(rv1 + BN_EPS) * g1 + beta1
    h = jnp.where(h > 0, h, NEG_SLOPE * h)
    h = h @ w2 + b2
    h = (h - rm2) / jnp.sqrt(rv2 + BN_EPS) * g2 + beta2
    h = jnp.where(h > 0, h, NEG_SLOPE * h)
    return h @ w3 + b3


if __name__ == "__main__":
    key = jax.random.PRNGKey(0)
    k_x, k_p = jax.random.split(key)

    B = 8
    x = jax.random.normal(k_x, (B, 17, 17), jnp.float32)
    params = init_params(k_p)

    logits = mlp3_forward(x, params)
    logits = jax.block_until_ready(logits)

    ref = reference_forward(x, params)
    assert logits.shape == (B, OUT)
    # bf16 MXU inputs -> loosened tolerance vs the f32 reference.
    assert jnp.allclose(logits, ref, atol=3e-2, rtol=3e-2), \
        f"mismatch: max abs err {jnp.max(jnp.abs(logits - ref))}"

    print("KERNEL_OK")
</pallas_src>

<mosaic_0001>
module attributes {stable_mosaic.version = 11 : i64} {
  func.func @mlp3_kernel(%arg0: i32, %arg1: memref<8x384xbf16, #tpu.memory_space<vmem>>, %arg2: memref<384x512xbf16, #tpu.memory_space<vmem>>, %arg3: memref<1x512xf32, #tpu.memory_space<vmem>>, %arg4: memref<512x128xbf16, #tpu.memory_space<vmem>>, %arg5: memref<1x128xf32, #tpu.memory_space<vmem>>, %arg6: memref<128x128xbf16, #tpu.memory_space<vmem>>, %arg7: memref<1x128xf32, #tpu.memory_space<vmem>>, %arg8: memref<8x128xf32, #tpu.memory_space<vmem>>) attributes {dimension_semantics = [#tpu.dimension_semantics<parallel>], iteration_bounds = array<i64: 1>, scalar_prefetch = 0 : i64, scratch_operands = 0 : i64, tpu.core_type = #tpu.core_type<tc>, window_params = [{transform_indices = @transform_0, window_bounds = array<i64: 8, 384>}, {pipeline_mode = #tpu.pipeline_mode<synchronous>, transform_indices = @transform_1, window_bounds = array<i64: 384, 512>}, {pipeline_mode = #tpu.pipeline_mode<synchronous>, transform_indices = @transform_2, window_bounds = array<i64: 1, 512>}, {pipeline_mode = #tpu.pipeline_mode<synchronous>, transform_indices = @transform_3, window_bounds = array<i64: 512, 128>}, {pipeline_mode = #tpu.pipeline_mode<synchronous>, transform_indices = @transform_4, window_bounds = array<i64: 1, 128>}, {pipeline_mode = #tpu.pipeline_mode<synchronous>, transform_indices = @transform_5, window_bounds = array<i64: 128, 128>}, {pipeline_mode = #tpu.pipeline_mode<synchronous>, transform_indices = @transform_6, window_bounds = array<i64: 1, 128>}, {transform_indices = @transform_7, window_bounds = array<i64: 8, 128>}]} {
    %c0 = arith.constant 0 : index
    %c0_0 = arith.constant 0 : index
    %0 = vector.load %arg1[%c0, %c0_0] : memref<8x384xbf16, #tpu.memory_space<vmem>>, vector<8x384xbf16>
    %c0_1 = arith.constant 0 : index
    %c0_2 = arith.constant 0 : index
    %1 = vector.load %arg2[%c0_1, %c0_2] : memref<384x512xbf16, #tpu.memory_space<vmem>>, vector<384x512xbf16>
    %cst = arith.constant dense<0.000000e+00> : vector<8x512xf32>
    %2 = tpu.matmul %0, %1, %cst {dimension_numbers = #tpu.dot_dimension_numbers<[1], [0], [0], [1], [0, 0, 1, 1], [], []>} : vector<8x384xbf16>, vector<384x512xbf16>, vector<8x512xf32> -> vector<8x512xf32>
    %c0_3 = arith.constant 0 : index
    %c0_4 = arith.constant 0 : index
    %3 = vector.load %arg3[%c0_3, %c0_4] : memref<1x512xf32, #tpu.memory_space<vmem>>, vector<1x512xf32>
    %4 = vector.broadcast %3 : vector<1x512xf32> to vector<8x512xf32>
    %5 = arith.addf %2, %4 : vector<8x512xf32>
    %cst_5 = arith.constant 0.000000e+00 : f32
    %6 = vector.broadcast %cst_5 : f32 to vector<8x512xf32>
    %7 = arith.cmpf ogt, %5, %6 : vector<8x512xf32>
    %cst_6 = arith.constant 0.00999999977 : f32
    %8 = vector.broadcast %cst_6 : f32 to vector<8x512xf32>
    %9 = arith.mulf %8, %5 : vector<8x512xf32>
    %10 = arith.select %7, %5, %9 : vector<8x512xi1>, vector<8x512xf32>
    %11 = arith.truncf %10 : vector<8x512xf32> to vector<8x512xbf16>
    %c0_7 = arith.constant 0 : index
    %c0_8 = arith.constant 0 : index
    %12 = vector.load %arg4[%c0_7, %c0_8] : memref<512x128xbf16, #tpu.memory_space<vmem>>, vector<512x128xbf16>
    %cst_9 = arith.constant dense<0.000000e+00> : vector<8x128xf32>
    %13 = tpu.matmul %11, %12, %cst_9 {dimension_numbers = #tpu.dot_dimension_numbers<[1], [0], [0], [1], [0, 0, 1, 1], [], []>} : vector<8x512xbf16>, vector<512x128xbf16>, vector<8x128xf32> -> vector<8x128xf32>
    %c0_10 = arith.constant 0 : index
    %c0_11 = arith.constant 0 : index
    %14 = vector.load %arg5[%c0_10, %c0_11] : memref<1x128xf32, #tpu.memory_space<vmem>>, vector<1x128xf32>
    %15 = vector.broadcast %14 : vector<1x128xf32> to vector<8x128xf32>
    %16 = arith.addf %13, %15 : vector<8x128xf32>
    %cst_12 = arith.constant 0.000000e+00 : f32
    %17 = vector.broadcast %cst_12 : f32 to vector<8x128xf32>
    %18 = arith.cmpf ogt, %16, %17 : vector<8x128xf32>
    %cst_13 = arith.constant 0.00999999977 : f32
    %19 = vector.broadcast %cst_13 : f32 to vector<8x128xf32>
    %20 = arith.mulf %19, %16 : vector<8x128xf32>
    %21 = arith.select %18, %16, %20 : vector<8x128xi1>, vector<8x128xf32>
    %22 = arith.truncf %21 : vector<8x128xf32> to vector<8x128xbf16>
    %c0_14 = arith.constant 0 : index
    %c0_15 = arith.constant 0 : index
    %23 = vector.load %arg6[%c0_14, %c0_15] : memref<128x128xbf16, #tpu.memory_space<vmem>>, vector<128x128xbf16>
    %cst_16 = arith.constant dense<0.000000e+00> : vector<8x128xf32>
    %24 = tpu.matmul %22, %23, %cst_16 {dimension_numbers = #tpu.dot_dimension_numbers<[1], [0], [0], [1], [0, 0, 1, 1], [], []>} : vector<8x128xbf16>, vector<128x128xbf16>, vector<8x128xf32> -> vector<8x128xf32>
    %c0_17 = arith.constant 0 : index
    %c0_18 = arith.constant 0 : index
    %25 = vector.load %arg7[%c0_17, %c0_18] : memref<1x128xf32, #tpu.memory_space<vmem>>, vector<1x128xf32>
    %26 = vector.broadcast %25 : vector<1x128xf32> to vector<8x128xf32>
    %27 = arith.addf %24, %26 : vector<8x128xf32>
    %c0_19 = arith.constant 0 : index
    %c0_20 = arith.constant 0 : index
    %28 = vector.load %arg8[%c0_19, %c0_20] : memref<8x128xf32, #tpu.memory_space<vmem>>, vector<8x128xf32>
    tpu.vector_store %arg8[%c0_19, %c0_20], %27 {strides = array<i32>} : memref<8x128xf32, #tpu.memory_space<vmem>>, vector<8x128xf32>,
    return
  }
  func.func @transform_0(%arg0: i32) -> (i32, i32) {
    %c0_i32 = arith.constant 0 : i32
    %c0_i32_0 = arith.constant 0 : i32
    return %arg0, %c0_i32 : i32, i32
  }
  func.func @transform_1(%arg0: i32) -> (i32, i32) {
    %c0_i32 = arith.constant 0 : i32
    %c0_i32_0 = arith.constant 0 : i32
    %c0_i32_1 = arith.constant 0 : i32
    return %c0_i32, %c0_i32_0 : i32, i32
  }
  func.func @transform_2(%arg0: i32) -> (i32, i32) {
    %c0_i32 = arith.constant 0 : i32
    %c0_i32_0 = arith.constant 0 : i32
    %c0_i32_1 = arith.constant 0 : i32
    return %c0_i32, %c0_i32_0 : i32, i32
  }
  func.func @transform_3(%arg0: i32) -> (i32, i32) {
    %c0_i32 = arith.constant 0 : i32
    %c0_i32_0 = arith.constant 0 : i32
    %c0_i32_1 = arith.constant 0 : i32
    return %c0_i32, %c0_i32_0 : i32, i32
  }
  func.func @transform_4(%arg0: i32) -> (i32, i32) {
    %c0_i32 = arith.constant 0 : i32
    %c0_i32_0 = arith.constant 0 : i32
    %c0_i32_1 = arith.constant 0 : i32
    return %c0_i32, %c0_i32_0 : i32, i32
  }
  func.func @transform_5(%arg0: i32) -> (i32, i32) {
    %c0_i32 = arith.constant 0 : i32
    %c0_i32_0 = arith.constant 0 : i32
    %c0_i32_1 = arith.constant 0 : i32
    return %c0_i32, %c0_i32_0 : i32, i32
  }
  func.func @transform_6(%arg0: i32) -> (i32, i32) {
    %c0_i32 = arith.constant 0 : i32
    %c0_i32_0 = arith.constant 0 : i32
    %c0_i32_1 = arith.constant 0 : i32
    return %c0_i32, %c0_i32_0 : i32, i32
  }
  func.func @transform_7(%arg0: i32) -> (i32, i32) {
    %c0_i32 = arith.constant 0 : i32
    %c0_i32_0 = arith.constant 0 : i32
    return %arg0, %c0_i32 : i32, i32
  }
}

</mosaic_0001>

<bundles_post_ra>
// kernel: mlp3_forward.1
= control target key start
LH: loop header
LB: loop body
LE: loop exit
PB: predicated region body
PF: predicated region fallthrough
CT: control target
= control target key end

     0   :  { %vm1699_vm4 = vmmov 0   ;;  %s2175_s1 = inlined_call_operand.vmem [shape: bf16[384,512], index: 1, kind: input, shape index: {}]   ;;  %s2176_s0 = inlined_call_operand.vmem [shape: bf16[8,384], index: 0, kind: input, shape index: {}]   ;;  %s2177_s3 = inlined_call_operand.vmem [shape: bf16[512,128], index: 3, kind: input, shape index: {}]   ;;  %s2178_s5 = inlined_call_operand.vmem [shape: bf16[128,128], index: 5, kind: input, shape index: {}]   ;;  %s2179_s2 = inlined_call_operand.vmem [shape: f32[1,512], index: 2, kind: input, shape index: {}]   ;;  %s2180_s4 = inlined_call_operand.vmem [shape: f32[1,128], index: 4, kind: input, shape index: {}]   ;;  %s2181_s6 = inlined_call_operand.vmem [shape: f32[1,128], index: 6, kind: input, shape index: {}]   ;;  %s2182_s7 = inlined_call_operand.vmem [shape: f32[8,128], index: 7, kind: output, shape index: {}]  }
   0x1   :  { %v1510_v0 = vld [vmem:[%s2175_s1 + $0x4] ss:$16 sps:$4 sm:$0xff]   ;;  %v1512_v1 = vld [vmem:[%s2175_s1 + $0xc] ss:$16 sps:$4 sm:$0xff]   ;;  %v1514_v2 = vld [vmem:[%s2175_s1] ss:$16 sps:$4 sm:$0xff]  }
   0x2   :  { %638 = vmatprep.subr.bf16.mxu0 %v1510_v0  ;;  %v1515_v3 = vld [vmem:[%s2175_s1 + $0x8] ss:$16 sps:$4 sm:$0xff]   ;;  %720 = vmatprep.subr.bf16.mxu1 %v1512_v1  ;;  %v1516_v4 = vld [vmem:[%s2175_s1 + $0x24] ss:$16 sps:$4 sm:$0xff]   ;;  %v1518_v5 = vld [vmem:[%s2175_s1 + $0x2c] ss:$16 sps:$4 sm:$0xff]  }
   0x3   :  { %639 = vmatpush1.bf16.msra.mxu0 %v1514_v2  ;;  %721 = vmatpush1.bf16.msra.mxu1 %v1515_v3  ;;  %v1520_v6 = vld [vmem:[%s2175_s1 + $0x20] ss:$16 sps:$4 sm:$0xff]   ;;  %v1521_v7 = vld [vmem:[%s2175_s1 + $0x28] ss:$16 sps:$4 sm:$0xff]   ;;  %v1522_v8 = vld [vmem:[%s2175_s1 + $0x44] ss:$16 sps:$4 sm:$0xff]  }
   0x4   :  { %640 = vmatprep.subr.bf16.mxu0 %v1516_v4  ;;  %722 = vmatprep.subr.bf16.mxu1 %v1518_v5  ;;  %v1524_v9 = vld [vmem:[%s2175_s1 + $0x4c] ss:$16 sps:$4 sm:$0xff]   ;;  %v1526_v10 = vld [vmem:[%s2175_s1 + $0x40] ss:$16 sps:$4 sm:$0xff]   ;;  %v1527_v11 = vld [vmem:[%s2175_s1 + $0x48] ss:$16 sps:$4 sm:$0xff]  }
   0x5   :  { %v1528_v12 = vld [vmem:[%s2175_s1 + $0x64] ss:$16 sps:$4 sm:$0xff]   ;;  %v1530_v13 = vld [vmem:[%s2175_s1 + $0x6c] ss:$16 sps:$4 sm:$0xff]   ;;  %v1532_v14 = vld [vmem:[%s2175_s1 + $0x60] ss:$16 sps:$4 sm:$0xff]  }
   0x6   :  { %v1533_v15 = vld [vmem:[%s2175_s1 + $0x68] ss:$16 sps:$4 sm:$0xff]   ;;  %v1534_v16 = vld [vmem:[%s2175_s1 + $0x84] ss:$16 sps:$4 sm:$0xff]   ;;  %v1536_v17 = vld [vmem:[%s2175_s1 + $0x8c] ss:$16 sps:$4 sm:$0xff]  }
   0x7   :  { %641 = vmatpush1.bf16.msra.mxu0 %v1520_v6  ;;  %723 = vmatpush1.bf16.msra.mxu1 %v1521_v7  ;;  %v1538_v18 = vld [vmem:[%s2175_s1 + $0x80] ss:$16 sps:$4 sm:$0xff]   ;;  %v1539_v19 = vld [vmem:[%s2175_s1 + $0x88] ss:$16 sps:$4 sm:$0xff]   ;;  %v1540_v20 = vld [vmem:[%s2175_s1 + $0xa4] ss:$16 sps:$4 sm:$0xff]  }
   0x8   :  { %642 = vmatprep.subr.bf16.mxu0 %v1522_v8  ;;  %724 = vmatprep.subr.bf16.mxu1 %v1524_v9  ;;  %v1542_v21 = vld [vmem:[%s2175_s1 + $0xac] ss:$16 sps:$4 sm:$0xff]   ;;  %v1544_v22 = vld [vmem:[%s2175_s1 + $0xa0] ss:$16 sps:$4 sm:$0xff]   ;;  %v1545_v23 = vld [vmem:[%s2175_s1 + $0xa8] ss:$16 sps:$4 sm:$0xff]  }
   0x9   :  { %v1546_v24 = vld [vmem:[%s2175_s1 + $0xc4] ss:$16 sps:$4 sm:$0xff]   ;;  %v1548_v25 = vld [vmem:[%s2175_s1 + $0xcc] ss:$16 sps:$4 sm:$0xff]   ;;  %v1550_v26 = vld [vmem:[%s2175_s1 + $0xc0] ss:$16 sps:$4 sm:$0xff]  }
   0xa   :  { %v1551_v27 = vld [vmem:[%s2175_s1 + $0xc8] ss:$16 sps:$4 sm:$0xff]   ;;  %v1552_v28 = vld [vmem:[%s2175_s1 + $0xe4] ss:$16 sps:$4 sm:$0xff]   ;;  %v1554_v29 = vld [vmem:[%s2175_s1 + $0xec] ss:$16 sps:$4 sm:$0xff]  }
   0xb   :  { %643 = vmatpush1.bf16.msra.mxu0 %v1526_v10  ;;  %725 = vmatpush1.bf16.msra.mxu1 %v1527_v11  ;;  %v1556_v30 = vld [vmem:[%s2175_s1 + $0xe0] ss:$16 sps:$4 sm:$0xff]   ;;  %v1557_v31 = vld [vmem:[%s2175_s1 + $0xe8] ss:$16 sps:$4 sm:$0xff]   ;;  %v1558_v32 = vld [vmem:[%s2175_s1 + $0x104] ss:$16 sps:$4 sm:$0xff]  }
   0xc   :  { %644 = vmatprep.subr.bf16.mxu0 %v1528_v12  ;;  %726 = vmatprep.subr.bf16.mxu1 %v1530_v13  ;;  %v1560_v33 = vld [vmem:[%s2175_s1 + $0x10c] ss:$16 sps:$4 sm:$0xff]   ;;  %v1562_v34 = vld [vmem:[%s2175_s1 + $0x100] ss:$16 sps:$4 sm:$0xff]   ;;  %v1563_v35 = vld [vmem:[%s2175_s1 + $0x108] ss:$16 sps:$4 sm:$0xff]  }
   0xd   :  { %v1564_v36 = vld [vmem:[%s2175_s1 + $0x124] ss:$16 sps:$4 sm:$0xff]   ;;  %v1566_v37 = vld [vmem:[%s2175_s1 + $0x12c] ss:$16 sps:$4 sm:$0xff]   ;;  %v1568_v38 = vld [vmem:[%s2175_s1 + $0x120] ss:$16 sps:$4 sm:$0xff]  }
   0xe   :  { %v1569_v39 = vld [vmem:[%s2175_s1 + $0x128] ss:$16 sps:$4 sm:$0xff]   ;;  %v1570_v40 = vld [vmem:[%s2175_s1 + $0x144] ss:$16 sps:$4 sm:$0xff]   ;;  %v1572_v41 = vld [vmem:[%s2175_s1 + $0x14c] ss:$16 sps:$4 sm:$0xff]  }
   0xf   :  { %645 = vmatpush1.bf16.msra.mxu0 %v1532_v14  ;;  %727 = vmatpush1.bf16.msra.mxu1 %v1533_v15  ;;  %v1574_v42 = vld [vmem:[%s2175_s1 + $0x140] ss:$16 sps:$4 sm:$0xff]   ;;  %v1575_v43 = vld [vmem:[%s2175_s1 + $0x148] ss:$16 sps:$4 sm:$0xff]   ;;  %v1576_v44 = vld [vmem:[%s2175_s1 + $0x164] ss:$16 sps:$4 sm:$0xff]  }
  0x10   :  { %646 = vmatprep.subr.bf16.mxu0 %v1534_v16  ;;  %728 = vmatprep.subr.bf16.mxu1 %v1536_v17  ;;  %v1578_v45 = vld [vmem:[%s2175_s1 + $0x16c] ss:$16 sps:$4 sm:$0xff]   ;;  %v27_v46 = vld [vmem:[%s2176_s0] sm:$0xff]  ;;  %v1581_v49 = vld [vmem:[%s2175_s1 + $0x168] ss:$16 sps:$4 sm:$0xff]   ;;  %v1697_v14 = vmov 0  }
  0x11   :  { %v1580_v47 = vld [vmem:[%s2175_s1 + $0x160] ss:$16 sps:$4 sm:$0xff]   ;;  %v1282_v48 = vcombine.high %v27_v46, %v27_v46  ;;  %v1582_v50 = vld [vmem:[%s2175_s1 + $0x184] ss:$16 sps:$4 sm:$0xff]   ;;  %v1584_v51 = vld [vmem:[%s2175_s1 + $0x18c] ss:$16 sps:$4 sm:$0xff]   ;;  %v1281_v4 = vcombine.low %v27_v46, %v27_v46 }
  0x12   :  { %v1586_v52 = vld [vmem:[%s2175_s1 + $0x180] ss:$16 sps:$4 sm:$0xff]   ;;  %v1587_v53 = vld [vmem:[%s2175_s1 + $0x188] ss:$16 sps:$4 sm:$0xff]   ;;  %v1588_v54 = vld [vmem:[%s2175_s1 + $0x1a4] ss:$16 sps:$4 sm:$0xff]  }
  0x13   :  { %647 = vmatpush1.bf16.msra.mxu0 %v1538_v18  ;;  %729 = vmatpush1.bf16.msra.mxu1 %v1539_v19  ;;  %v1590_v55 = vld [vmem:[%s2175_s1 + $0x1ac] ss:$16 sps:$4 sm:$0xff]   ;;  %v1592_v56 = vld [vmem:[%s2175_s1 + $0x1a0] ss:$16 sps:$4 sm:$0xff]   ;;  %v1593_v57 = vld [vmem:[%s2175_s1 + $0x1a8] ss:$16 sps:$4 sm:$0xff]  }
  0x14   :  { %648 = vmatprep.subr.bf16.mxu0 %v1540_v20  ;;  %730 = vmatprep.subr.bf16.mxu1 %v1542_v21  ;;  %v1594_v58 = vld [vmem:[%s2175_s1 + $0x1c4] ss:$16 sps:$4 sm:$0xff]   ;;  %v1596_v59 = vld [vmem:[%s2175_s1 + $0x1cc] ss:$16 sps:$4 sm:$0xff]   ;;  %v1598_v60 = vld [vmem:[%s2175_s1 + $0x1c0] ss:$16 sps:$4 sm:$0xff]  }
  0x15   :  { %670 = vmatprep.mubr.bf16.mxu0 %v1282_v48  ;;  %752 = vmatprep.mubr.bf16.mxu1 %v1282_v48  ;;  %v1599_v61 = vld [vmem:[%s2175_s1 + $0x1c8] ss:$16 sps:$4 sm:$0xff]   ;;  %v1600_v62 = vld [vmem:[%s2175_s1 + $0x1e4] ss:$16 sps:$4 sm:$0xff]   ;;  %v1602_v63 = vld [vmem:[%s2175_s1 + $0x1ec] ss:$16 sps:$4 sm:$0xff]  }
  0x16   :  { %v1604_v0 = vld [vmem:[%s2175_s1 + $0x1e0] ss:$16 sps:$4 sm:$0xff]   ;;  %v1605_v1 = vld [vmem:[%s2175_s1 + $0x1e8] ss:$16 sps:$4 sm:$0xff]   ;;  %v1611_v2 = vld [vmem:[%s2175_s1 + $0x204] ss:$16 sps:$4 sm:$0xff]  }
  0x17   :  { %649 = vmatpush1.bf16.msra.mxu0 %v1544_v22  ;;  %731 = vmatpush1.bf16.msra.mxu1 %v1545_v23  ;;  %v1614_v3 = vld [vmem:[%s2175_s1 + $0x20c] ss:$16 sps:$4 sm:$0xff]   ;;  %v1609_v5 = vld [vmem:[%s2175_s1 + $0x200] ss:$16 sps:$4 sm:$0xff]   ;;  %v1612_v6 = vld [vmem:[%s2175_s1 + $0x208] ss:$16 sps:$4 sm:$0xff]  }
  0x18   :  { %650 = vmatprep.subr.bf16.mxu0 %v1546_v24  ;;  %732 = vmatprep.subr.bf16.mxu1 %v1548_v25  ;;  %v1617_v7 = vld [vmem:[%s2175_s1 + $0x224] ss:$16 sps:$4 sm:$0xff]   ;;  %v1620_v8 = vld [vmem:[%s2175_s1 + $0x22c] ss:$16 sps:$4 sm:$0xff]   ;;  %v1615_v9 = vld [vmem:[%s2175_s1 + $0x220] ss:$16 sps:$4 sm:$0xff]  }
  0x19   :  { %v1618_v10 = vld [vmem:[%s2175_s1 + $0x228] ss:$16 sps:$4 sm:$0xff]   ;;  %v1623_v11 = vld [vmem:[%s2175_s1 + $0x244] ss:$16 sps:$4 sm:$0xff]   ;;  %v1626_v12 = vld [vmem:[%s2175_s1 + $0x24c] ss:$16 sps:$4 sm:$0xff]  }
  0x1a   :  { %v1621_v13 = vld [vmem:[%s2175_s1 + $0x240] ss:$16 sps:$4 sm:$0xff]   ;;  %v1624_v15 = vld [vmem:[%s2175_s1 + $0x248] ss:$16 sps:$4 sm:$0xff]   ;;  %v1629_v16 = vld [vmem:[%s2175_s1 + $0x264] ss:$16 sps:$4 sm:$0xff]  }
  0x1b   :  { %651 = vmatpush1.bf16.msra.mxu0 %v1550_v26  ;;  %733 = vmatpush1.bf16.msra.mxu1 %v1551_v27  ;;  %v1632_v17 = vld [vmem:[%s2175_s1 + $0x26c] ss:$16 sps:$4 sm:$0xff]   ;;  %v1627_v18 = vld [vmem:[%s2175_s1 + $0x260] ss:$16 sps:$4 sm:$0xff]   ;;  %v1630_v19 = vld [vmem:[%s2175_s1 + $0x268] ss:$16 sps:$4 sm:$0xff]  }
  0x1c   :  { %652 = vmatprep.subr.bf16.mxu0 %v1552_v28  ;;  %734 = vmatprep.subr.bf16.mxu1 %v1554_v29  ;;  %v1635_v20 = vld [vmem:[%s2175_s1 + $0x284] ss:$16 sps:$4 sm:$0xff]   ;;  %v1638_v21 = vld [vmem:[%s2175_s1 + $0x28c] ss:$16 sps:$4 sm:$0xff]   ;;  %v1633_v22 = vld [vmem:[%s2175_s1 + $0x280] ss:$16 sps:$4 sm:$0xff]  }
  0x1d   :  { %v1636_v23 = vld [vmem:[%s2175_s1 + $0x288] ss:$16 sps:$4 sm:$0xff]   ;;  %v1641_v24 = vld [vmem:[%s2175_s1 + $0x2a4] ss:$16 sps:$4 sm:$0xff]   ;;  %v1644_v25 = vld [vmem:[%s2175_s1 + $0x2ac] ss:$16 sps:$4 sm:$0xff]  }
  0x1e   :  { %v1639_v26 = vld [vmem:[%s2175_s1 + $0x2a0] ss:$16 sps:$4 sm:$0xff]   ;;  %v1642_v27 = vld [vmem:[%s2175_s1 + $0x2a8] ss:$16 sps:$4 sm:$0xff]   ;;  %v1647_v28 = vld [vmem:[%s2175_s1 + $0x2c4] ss:$16 sps:$4 sm:$0xff]  }
  0x1f   :  { %653 = vmatpush1.bf16.msra.mxu0 %v1556_v30  ;;  %735 = vmatpush1.bf16.msra.mxu1 %v1557_v31  ;;  %v1650_v29 = vld [vmem:[%s2175_s1 + $0x2cc] ss:$16 sps:$4 sm:$0xff]   ;;  %v1645_v30 = vld [vmem:[%s2175_s1 + $0x2c0] ss:$16 sps:$4 sm:$0xff]   ;;  %v1648_v31 = vld [vmem:[%s2175_s1 + $0x2c8] ss:$16 sps:$4 sm:$0xff]  }
  0x20   :  { %654 = vmatprep.subr.bf16.mxu0 %v1558_v32  ;;  %736 = vmatprep.subr.bf16.mxu1 %v1560_v33  ;;  %v1653_v32 = vld [vmem:[%s2175_s1 + $0x2e4] ss:$16 sps:$4 sm:$0xff]   ;;  %v1656_v33 = vld [vmem:[%s2175_s1 + $0x2ec] ss:$16 sps:$4 sm:$0xff]  }
  0x21   :  { %v1666_v46 = vld [vmem:[%s2177_s3 + $0xd0] sm:$0xff]  }
  0x22   :  { %v1668_v48 = vld [vmem:[%s2177_s3 + $0x90] sm:$0xff]  }
  0x23   :  { %655 = vmatpush1.bf16.msra.mxu0 %v1562_v34  ;;  %737 = vmatpush1.bf16.msra.mxu1 %v1563_v35  ;;  %v1651_v34 = vld [vmem:[%s2175_s1 + $0x2e0] ss:$16 sps:$4 sm:$0xff]   ;;  %v1654_v35 = vld [vmem:[%s2175_s1 + $0x2e8] ss:$16 sps:$4 sm:$0xff]  }
  0x24   :  { %656 = vmatprep.subr.bf16.mxu0 %v1564_v36  ;;  %738 = vmatprep.subr.bf16.mxu1 %v1566_v37  ;;  %v1657_v36 = vld [vmem:[%s2177_s3 + $0x40] sm:$0xff]  }
  0x25   :  { %v1658_v37 = vld [vmem:[%s2177_s3 + $0xc0] sm:$0xff]  }
  0x27   :  { %657 = vmatpush1.bf16.msra.mxu0 %v1568_v38  ;;  %739 = vmatpush1.bf16.msra.mxu1 %v1569_v39  ;;  %v1608_v38 = vld [vmem:[%s2176_s0 + $0x8] ss:$0 sps:$4 sm:$0xff]   ;;  %v1659_v39 = vld [vmem:[%s2177_s3] sm:$0xff]  }
  0x28   :  { %658 = vmatprep.subr.bf16.mxu0 %v1570_v40  ;;  %740 = vmatprep.subr.bf16.mxu1 %v1572_v41  ;;  %v1660_v40 = vld [vmem:[%s2177_s3 + $0x80] sm:$0xff]   ;;  %v1661_v41 = vld [vmem:[%s2177_s3 + $0x48] sm:$0xff]  }
  0x2b   :  { %659 = vmatpush1.bf16.msra.mxu0 %v1574_v42  ;;  %741 = vmatpush1.bf16.msra.mxu1 %v1575_v43  ;;  %v1662_v42 = vld [vmem:[%s2177_s3 + $0xc8] sm:$0xff]  }
  0x2c   :  { %660 = vmatprep.subr.bf16.mxu0 %v1576_v44  ;;  %742 = vmatprep.subr.bf16.mxu1 %v1578_v45  ;;  %v1663_v43 = vld [vmem:[%s2177_s3 + $0x8] sm:$0xff]   ;;  %v1665_v45 = vld [vmem:[%s2177_s3 + $0x50] sm:$0xff]  }
  0x2d   :  { %v1664_v44 = vld [vmem:[%s2177_s3 + $0x88] sm:$0xff]  }
  0x2f   :  { %661 = vmatpush1.bf16.msra.mxu0 %v1580_v47  ;;  %743 = vmatpush1.bf16.msra.mxu1 %v1581_v49  ;;  %v1667_v47 = vld [vmem:[%s2177_s3 + $0x10] sm:$0xff]   ;;  %v1669_v49 = vld [vmem:[%s2177_s3 + $0x58] sm:$0xff]  }
  0x30   :  { %662 = vmatprep.subr.bf16.mxu0 %v1582_v50  ;;  %744 = vmatprep.subr.bf16.mxu1 %v1584_v51  ;;  %v1670_v50 = vld [vmem:[%s2177_s3 + $0xd8] sm:$0xff]  }
  0x31   :  { %v1671_v51 = vld [vmem:[%s2177_s3 + $0x18] sm:$0xff]  }
  0x33   :  { %663 = vmatpush1.bf16.msra.mxu0 %v1586_v52  ;;  %745 = vmatpush1.bf16.msra.mxu1 %v1587_v53  ;;  %v1672_v52 = vld [vmem:[%s2177_s3 + $0x98] sm:$0xff]   ;;  %v1673_v53 = vld [vmem:[%s2177_s3 + $0x60] sm:$0xff]  }
  0x34   :  { %664 = vmatprep.subr.bf16.mxu0 %v1588_v54  ;;  %746 = vmatprep.subr.bf16.mxu1 %v1590_v55  ;;  %v1674_v54 = vld [vmem:[%s2177_s3 + $0xe0] sm:$0xff]  }
  0x35   :  { %v1675_v55 = vld [vmem:[%s2177_s3 + $0x20] sm:$0xff]  }
  0x37   :  { %665 = vmatpush1.bf16.msra.mxu0 %v1592_v56  ;;  %747 = vmatpush1.bf16.msra.mxu1 %v1593_v57  ;;  %v1676_v56 = vld [vmem:[%s2177_s3 + $0xa0] sm:$0xff]   ;;  %v1677_v57 = vld [vmem:[%s2177_s3 + $0x68] sm:$0xff]  }
  0x38   :  { %666 = vmatprep.subr.bf16.mxu0 %v1594_v58  ;;  %748 = vmatprep.subr.bf16.mxu1 %v1596_v59  ;;  %v1678_v58 = vld [vmem:[%s2177_s3 + $0xe8] sm:$0xff]  }
  0x39   :  { %v1679_v59 = vld [vmem:[%s2177_s3 + $0x28] sm:$0xff]  }
  0x3b   :  { %667 = vmatpush1.bf16.msra.mxu0 %v1598_v60  ;;  %749 = vmatpush1.bf16.msra.mxu1 %v1599_v61  ;;  %v1680_v60 = vld [vmem:[%s2177_s3 + $0xa8] sm:$0xff]   ;;  %v1681_v61 = vld [vmem:[%s2177_s3 + $0x70] sm:$0xff]  }
  0x3c   :  { %668 = vmatprep.subr.bf16.mxu0 %v1600_v62  ;;  %750 = vmatprep.subr.bf16.mxu1 %v1602_v63  ;;  %v1682_v62 = vld [vmem:[%s2177_s3 + $0xf0] sm:$0xff]  }
  0x3d   :  { %v1683_v63 = vld [vmem:[%s2177_s3 + $0x30] sm:$0xff]  }
  0x3f   :  { %669 = vmatpush1.bf16.msra.mxu0 %v1604_v0  ;;  %751 = vmatpush1.bf16.msra.mxu1 %v1605_v1  ;;  %v1684_v0 = vld [vmem:[%s2177_s3 + $0xb0] sm:$0xff]   ;;  %v1685_v1 = vld [vmem:[%s2177_s3 + $0x78] sm:$0xff]  }
  0x40   :  { %679 = vmatprep.subr.bf16.mxu0 %v1611_v2  ;;  %761 = vmatprep.subr.bf16.mxu1 %v1614_v3  ;;  %v1686_v2 = vld [vmem:[%s2177_s3 + $0xf8] sm:$0xff]  }
  0x41   :  { %v1687_v3 = vld [vmem:[%s2177_s3 + $0x38] sm:$0xff]  }
  0x42   :  { %671 = vmatmul.mubr.bf16.vlgmr.msra.gmra.mrb[0].mxu0 %v1281_v4  ;;  %753 = vmatmul.mubr.bf16.vlgmr.msra.gmra.mrb[0].mxu1 %v1281_v4  ;;  %v1688_v4 = vld [vmem:[%s2177_s3 + $0xb8] sm:$0xff]  }
  0x43   :  { %680 = vmatpush1.bf16.msra.mxu0 %v1609_v5  ;;  %762 = vmatpush1.bf16.msra.mxu1 %v1612_v6  ;;  %v1698_v5 = vmov 0.0   ;;  %v127_v6 = vlaneseq }
  0x44   :  { %681 = vmatprep.subr.bf16.mxu0 %v1617_v7  ;;  %763 = vmatprep.subr.bf16.mxu1 %v1620_v8 }
  0x45   :  { %711 = vmatprep.mubr.bf16.mxu0 %v1697_v14  ;;  %793 = vmatprep.mubr.bf16.mxu1 %v1697_v14  ;;  %v128_v7 = vshrl.u32 %v127_v6, 7 }
  0x47   :  { %682 = vmatpush1.bf16.msra.mxu0 %v1615_v9  ;;  %764 = vmatpush1.bf16.msra.mxu1 %v1618_v10  ;;  %v129_v8 = vsub.s32 0, %v128_v7  ;;  %v137_v9 = vsub.s32 2, %v128_v7  ;;  %v125_v10 = vld [vmem:[%s2179_s2] sm:$0xf] }
  0x48   :  { %683 = vmatprep.subr.bf16.mxu0 %v1623_v11  ;;  %765 = vmatprep.subr.bf16.mxu1 %v1626_v12  ;;  %v133_v11 = vsub.s32 1, %v128_v7  ;;  %v141_v12 = vsub.s32 3, %v128_v7 }
  0x49   :  { %v138_v14 = vrot.slane %v125_v10, %v137_v9 }
  0x4b   :  { %684 = vmatpush1.bf16.msra.mxu0 %v1621_v13  ;;  %766 = vmatpush1.bf16.msra.mxu1 %v1624_v15  ;;  %v130_v13 = vrot.slane %v125_v10, %v129_v8  ;;  %v134_v15 = vrot.slane %v125_v10, %v133_v11 }
  0x4c   :  { %685 = vmatprep.subr.bf16.mxu0 %v1629_v16  ;;  %767 = vmatprep.subr.bf16.mxu1 %v1632_v17  ;;  %v142_v16 = vrot.slane %v125_v10, %v141_v12 }
  0x4f   :  { %686 = vmatpush1.bf16.msra.mxu0 %v1627_v18  ;;  %768 = vmatpush1.bf16.msra.mxu1 %v1630_v19 }
  0x50   :  { %687 = vmatprep.subr.bf16.mxu0 %v1635_v20  ;;  %769 = vmatprep.subr.bf16.mxu1 %v1638_v21 }
  0x53   :  { %688 = vmatpush1.bf16.msra.mxu0 %v1633_v22  ;;  %770 = vmatpush1.bf16.msra.mxu1 %v1636_v23 }
  0x54   :  { %689 = vmatprep.subr.bf16.mxu0 %v1641_v24  ;;  %771 = vmatprep.subr.bf16.mxu1 %v1644_v25 }
  0x57   :  { %690 = vmatpush1.bf16.msra.mxu0 %v1639_v26  ;;  %772 = vmatpush1.bf16.msra.mxu1 %v1642_v27 }
  0x58   :  { %691 = vmatprep.subr.bf16.mxu0 %v1647_v28  ;;  %773 = vmatprep.subr.bf16.mxu1 %v1650_v29 }
  0x5b   :  { %692 = vmatpush1.bf16.msra.mxu0 %v1645_v30  ;;  %774 = vmatpush1.bf16.msra.mxu1 %v1648_v31 }
  0x5c   :  { %693 = vmatprep.subr.bf16.mxu0 %v1653_v32  ;;  %775 = vmatprep.subr.bf16.mxu1 %v1656_v33 }
  0x5f   :  { %694 = vmatpush1.bf16.msra.mxu0 %v1651_v34  ;;  %776 = vmatpush1.bf16.msra.mxu1 %v1654_v35 }
  0x60   :  { %1422 = vmatprep.subr.bf16.mxu0 %v1657_v36  ;;  %1444 = vmatprep.subr.bf16.mxu1 %v1658_v37 }
  0x62   :  { %712 = vmatmul.mubr.bf16.vlgmr.msra.gmra.mrb[0].mxu0 %v1608_v38  ;;  %794 = vmatmul.mubr.bf16.vlgmr.msra.gmra.mrb[0].mxu1 %v1608_v38 }
  0x63   :  { %1423 = vmatpush3.bf16.msra.mxu0 %v1659_v39  ;;  %1445 = vmatpush3.bf16.msra.mxu1 %v1660_v40  ;;  %v1689_v39 = vld [vmem:[%s2178_s5] sm:$0xff]  }
  0x64   :  { %1424 = vmatprep.subr.bf16.mxu0 %v1661_v41  ;;  %1446 = vmatprep.subr.bf16.mxu1 %v1662_v42  ;;  %v1690_v42 = vld [vmem:[%s2178_s5 + $0x8] sm:$0xff]  }
  0x67   :  { %1425 = vmatpush3.bf16.msra.mxu0 %v1663_v43  ;;  %1447 = vmatpush3.bf16.msra.mxu1 %v1664_v44  ;;  %v1691_v43 = vld [vmem:[%s2178_s5 + $0x10] sm:$0xff]   ;;  %v1692_v44 = vld [vmem:[%s2178_s5 + $0x18] sm:$0xff]  }
  0x68   :  { %1426 = vmatprep.subr.bf16.mxu0 %v1665_v45  ;;  %1448 = vmatprep.subr.bf16.mxu1 %v1666_v46  ;;  %v1693_v45 = vld [vmem:[%s2178_s5 + $0x20] sm:$0xff]   ;;  %v1694_v46 = vld [vmem:[%s2178_s5 + $0x28] sm:$0xff]  }
  0x6b   :  { %1427 = vmatpush3.bf16.msra.mxu0 %v1667_v47  ;;  %1449 = vmatpush3.bf16.msra.mxu1 %v1668_v48  ;;  %v1695_v47 = vld [vmem:[%s2178_s5 + $0x30] sm:$0xff]   ;;  %v1696_v48 = vld [vmem:[%s2178_s5 + $0x38] sm:$0xff]  }
  0x6c   :  { %1428 = vmatprep.subr.bf16.mxu0 %v1669_v49  ;;  %1450 = vmatprep.subr.bf16.mxu1 %v1670_v50 }
  0x6f   :  { %1429 = vmatpush3.bf16.msra.mxu0 %v1671_v51  ;;  %1451 = vmatpush3.bf16.msra.mxu1 %v1672_v52  ;;  %v1380_v51 = vld [vmem:[%s2180_s4] ss:$0 sm:$0xff] }
  0x70   :  { %1430 = vmatprep.subr.bf16.mxu0 %v1673_v53  ;;  %1452 = vmatprep.subr.bf16.mxu1 %v1674_v54 }
  0x73   :  { %1431 = vmatpush3.bf16.msra.mxu0 %v1675_v55  ;;  %1453 = vmatpush3.bf16.msra.mxu1 %v1676_v56 }
  0x74   :  { %1432 = vmatprep.subr.bf16.mxu0 %v1677_v57  ;;  %1454 = vmatprep.subr.bf16.mxu1 %v1678_v58 }
  0x77   :  { %1433 = vmatpush3.bf16.msra.mxu0 %v1679_v59  ;;  %1455 = vmatpush3.bf16.msra.mxu1 %v1680_v60 }
  0x78   :  { %1434 = vmatprep.subr.bf16.mxu0 %v1681_v61  ;;  %1456 = vmatprep.subr.bf16.mxu1 %v1682_v62 }
  0x7b   :  { %1435 = vmatpush3.bf16.msra.mxu0 %v1683_v63  ;;  %1457 = vmatpush3.bf16.msra.mxu1 %v1684_v0 }
  0x7c   :  { %1436 = vmatprep.subr.bf16.mxu0 %v1685_v1  ;;  %1458 = vmatprep.subr.bf16.mxu1 %v1686_v2  ;;  %v1413_v1 = vld [vmem:[%s2181_s6] ss:$0 sm:$0xff] }
  0x7f   :  { %1437 = vmatpush3.bf16.msra.mxu0 %v1687_v3  ;;  %1459 = vmatpush3.bf16.msra.mxu1 %v1688_v4 }
  0x80   :  { %1475 = vmatprep.subr.bf16.mxu0 %v1698_v5 }
 0x135   :  { %v713_v17 = vpop.f32.mrb[0].mxu0  ;;  %v795_v18 = vpop.f32.mrb[0].mxu1 }
 0x136   :  { %v1495_v19 = vadd.f32 %v713_v17, %v130_v13  ;;  %v1497_v20 = vadd.f32 %v795_v18, %v138_v14  ;;  %v715_v21 = vpop.f32.mrb[1].mxu0  ;;  %v797_v22 = vpop.f32.mrb[1].mxu1 }
 0x137   :  { %v1496_v23 = vadd.f32 %v715_v21, %v134_v15  ;;  %v1498_v24 = vadd.f32 %v797_v22, %v142_v16  ;;  %v717_v25 = vpop.f32.mrb[2].mxu0  ;;  %v799_v26 = vpop.f32.mrb[2].mxu1 }
 0x138   :  { %vm802_vm0 = vcmp.gt.f32.partialorder %v1495_v19, 0.0  ;;  %v806_v27 = vmul.f32 0.01, %v1495_v19  ;;  %vm804_vm1 = vcmp.gt.f32.partialorder %v1497_v20, 0.0  ;;  %v808_v28 = vmul.f32 0.01, %v1497_v20 }
 0x139   :  { %vm803_vm2 = vcmp.gt.f32.partialorder %v1496_v23, 0.0  ;;  %v807_v29 = vmul.f32 0.01, %v1496_v23  ;;  %vm805_vm3 = vcmp.gt.f32.partialorder %v1498_v24, 0.0  ;;  %v809_v30 = vmul.f32 0.01, %v1498_v24 }
 0x13a   :  { %v810_v31 = vsel %vm802_vm0, %v1495_v19, %v806_v27  ;;  %v812_v32 = vsel %vm804_vm1, %v1497_v20, %v808_v28  ;;  %v718_v33 = vpop.f32.mrb[3].mxu0  ;;  %v800_v34 = vpop.f32.mrb[3].mxu1 }
 0x13b   :  { %v811_v35 = vsel %vm803_vm2, %v1496_v23, %v807_v29  ;;  %v813_v36 = vsel %vm805_vm3, %v1498_v24, %v809_v30  ;;  %v814_v40 = vpack.c.bf16 %v810_v31, %v810_v31  ;;  %v816_v41 = vpack.c.bf16 %v812_v32, %v812_v32 }
 0x13c   :  { %v815_v37 = vpack.c.bf16 %v811_v35, %v811_v35  ;;  %v817_v38 = vpack.c.bf16 %v813_v36, %v813_v36 }
 0x13e   :  { %1113 = vmatprep.mubr.bf16.mxu0 %v815_v37  ;;  %1153 = vmatprep.mubr.bf16.mxu1 %v817_v38 }
 0x13f   :  { %1114 = vmatmul.mubr.bf16.vlgmr.msra.gmra.mrb[4].mxu0 %v814_v40  ;;  %1154 = vmatmul.mubr.bf16.vlgmr.msra.gmra.mrb[4].mxu1 %v816_v41 }
 0x140   :  { %1476 = vmatpush3.bf16.msra.mxu0 %v1689_v39  ;;  %1491 = vmatprep.mubr.msk.bf16.mxu0 %vm1699_vm4, %v1698_v5 }
 0x141   :  { %1477 = vmatprep.subr.bf16.mxu0 %v1698_v5 }
 0x144   :  { %1478 = vmatpush3.bf16.msra.mxu0 %v1690_v42 }
 0x145   :  { %1479 = vmatprep.subr.bf16.mxu0 %v1698_v5 }
 0x148   :  { %1480 = vmatpush3.bf16.msra.mxu0 %v1691_v43 }
 0x149   :  { %1481 = vmatprep.subr.bf16.mxu0 %v1698_v5 }
 0x14c   :  { %1482 = vmatpush3.bf16.msra.mxu0 %v1692_v44 }
 0x14d   :  { %1483 = vmatprep.subr.bf16.mxu0 %v1698_v5 }
 0x150   :  { %1484 = vmatpush3.bf16.msra.mxu0 %v1693_v45 }
 0x151   :  { %1485 = vmatprep.subr.bf16.mxu0 %v1698_v5 }
 0x154   :  { %1486 = vmatpush3.bf16.msra.mxu0 %v1694_v46 }
 0x155   :  { %1487 = vmatprep.subr.bf16.mxu0 %v1698_v5 }
 0x158   :  { %1488 = vmatpush3.bf16.msra.mxu0 %v1695_v47 }
 0x159   :  { %1489 = vmatprep.subr.bf16.mxu0 %v1698_v5 }
 0x15c   :  { %1490 = vmatpush3.bf16.msra.mxu0 %v1696_v48 }
 0x212   :  { %v1438_v49 = vpop.f32.mrb[4].mxu0  ;;  %v1460_v50 = vpop.f32.mrb[4].mxu1 }
 0x213   :  { %v1439_v52 = vpop.f32.mrb[5].mxu0  ;;  %v1461_v53 = vpop.f32.mrb[5].mxu1 }
 0x214   :  { %v1440_v54 = vadd.f32 %v1439_v52, %v1438_v49  ;;  %v1462_v55 = vadd.f32 %v1461_v53, %v1460_v50  ;;  %v1441_v56 = vpop.f32.mrb[6].mxu0  ;;  %v1463_v57 = vpop.f32.mrb[6].mxu1 }
 0x215   :  { %v1442_v58 = vpop.f32.mrb[7].mxu0  ;;  %v1464_v59 = vpop.f32.mrb[7].mxu1 }
 0x216   :  { %v1116_v60 = vadd.f32 %v1440_v54, %v1380_v51 }
 0x218   :  { %v1156_v61 = vadd.f32 %v1462_v55, %v1116_v60 }
 0x21a   :  { %vm1161_vm5 = vcmp.gt.f32.partialorder %v1156_v61, 0.0  ;;  %v1162_v62 = vmul.f32 0.01, %v1156_v61 }
 0x21c   :  { %v1163_v63 = vsel %vm1161_vm5, %v1156_v61, %v1162_v62 }
 0x21d   :  { %v1164_v0 = vpack.c.bf16 %v1163_v63, %v1163_v63 }
 0x21f   :  { %1492 = vmatmul.mubr.bf16.vlgmr.msra.gmra.mrb[8].mxu0 %v1164_v0 }
 0x2f2   :  { %v1270_v2 = vpop.f32.mrb[8].mxu0 }
 0x2f3   :  { %v1271_v3 = vadd.f32 %v1413_v1, %v1270_v2  ;;  %v1493_v4 = vpop.f32.mrb[9].mxu0 }
 0x2f4   :  { %v1273_v5 = vpop.f32.mrb[10].mxu0 }
 0x2f5   :  { %1276 = vst [vmem:[%s2182_s7] sm:$0xff] %v1271_v3  ;;  %v1494_v6 = vpop.f32.mrb[11].mxu0 }

</bundles_post_ra>
